<compile_context>
chip_gen: v6e
topology: v6e:2x2x1
jax: 0.10.0
libtpu: 0.0.40
codegen_flags: <defaults>
</compile_context>

<pallas_src>
import math

import jax
import jax.numpy as jnp
from jax.experimental import pallas as pl
from jax.experimental.pallas import tpu as pltpu


def _pos_enc_kernel(x_ref, pe_ref, o_ref):
    # Batched path: x/o are (ts, batch, d_model), pe is (ts, 1, d_model) ->
    # cheap sublane broadcast.  Batch-1 path: both 2-D (ts, d_model).
    # No replicated VMEM temp in either case.
    o_ref[...] = x_ref[...] + pe_ref[...]


def make_pe(d_model: int, max_len: int = 5000, dtype=jnp.float32) -> jnp.ndarray:
    """Buffer setup identical to the PyTorch __init__ (pre-cast to `dtype`)."""
    position = jnp.arange(max_len, dtype=jnp.float32)[:, None]            # (max_len, 1)
    div_term = jnp.exp(
        jnp.arange(0, d_model, 2, dtype=jnp.float32)
        * (-math.log(10000.0) / d_model)
    )                                                                     # (d_model/2,)
    angles = position * div_term                                          # (max_len, d_model/2)
    pe = jnp.zeros((max_len, 1, d_model), dtype=jnp.float32)
    pe = pe.at[:, 0, 0::2].set(jnp.sin(angles))
    pe = pe.at[:, 0, 1::2].set(jnp.cos(angles))
    return pe.astype(dtype)


_VMEM_LIMIT = 32 * 1024 * 1024   # explicit scoped-VMEM limit; safe on v5e/v6e/v7x
_X_TILE_CAP = 4 * 1024 * 1024    # per-step x-tile cap (bandwidth plateaus ~1-4 MiB)
_X_TILE_FLOOR = 1 * 1024 * 1024  # don't shrink x tiles below ~1 MiB just for steps
_MIN_STEPS = 8                   # >= 4 grid steps per TensorCore on v7x


def _rd8(n: int) -> int:
    return (n // 8) * 8


def _pick_seq_tile(seq_len: int, row_x: int, row_pe: int, lead_mult8: bool):
    """Pick the sequence-tile row count and the VMEM limit.

    row_x / row_pe are VMEM bytes per *sequence row* of the x/out and pe
    tiles using their padded (sublane, lane) footprints, so the budget
    matches everything the pipeline really allocates per step:
    double-buffered x, out and pe tiles (there is no other per-step temp).
    """
    budget = (_VMEM_LIMIT * 3) // 4
    bytes_per_row = 4 * row_x + 2 * row_pe            # 2*(x) + 2*(out) + 2*(pe)
    ts = max(1, budget // max(bytes_per_row, 1))
    ts = min(ts, max(1, _X_TILE_CAP // max(row_x, 1)))
    ts = max(8, _rd8(ts))

    if seq_len >= 16:
        floor_rows = max(8, _rd8(_X_TILE_FLOOR // max(row_x, 1)))
        steps_ts = _rd8(seq_len // _MIN_STEPS)
        if steps_ts >= floor_rows:
            ts = min(ts, steps_ts)                    # >= _MIN_STEPS steps, >= ~1 MiB tiles
        else:
            # Too short for that many full-size steps; still split the
            # sequence so both v7x TensorCores get at least one step.
            ts = min(ts, max(8, min(floor_rows, _rd8(seq_len // 2))))

    if lead_mult8:
        ts = min(ts, _rd8(seq_len))   # 2-D path: caller guarantees seq_len >= 8
    else:
        ts = min(ts, seq_len)         # 3-D path: leading dim has no (8,128) rule
    return max(1, ts), _VMEM_LIMIT


def positional_encoding(x: jnp.ndarray, pe: jnp.ndarray) -> jnp.ndarray:
    """x: [seq_len, batch, d_model];  pe: [max_len, 1, d_model] from make_pe."""
    seq_len, batch, d_model = x.shape
    max_len = pe.shape[0]
    if seq_len > max_len:
        raise ValueError(f"seq_len={seq_len} exceeds positional-encoding max_len={max_len}")
    if pe.dtype != x.dtype:
        # Fallback only; build pe with make_pe(..., dtype=x.dtype) to keep
        # this cast out of the per-call hot path.
        pe = pe.astype(x.dtype)

    itemsize = jnp.dtype(x.dtype).itemsize
    lane = ((d_model + 127) // 128) * 128             # lane-padded d_model

    if batch == 1 and seq_len >= 8:
        # Dense 2-D path (bitcast reshapes; no broadcast, no padding waste).
        x_in = x.reshape(seq_len, d_model)
        pe_in = pe.reshape(max_len, d_model)
        row_x = lane * itemsize
        row_pe = lane * itemsize
        ts, vmem_limit = _pick_seq_tile(seq_len, row_x, row_pe, lead_mult8=True)
        in_specs = [pl.BlockSpec((ts, d_model), lambda i: (i, 0)),
                    pl.BlockSpec((ts, d_model), lambda i: (i, 0))]
        out_spec = pl.BlockSpec((ts, d_model), lambda i: (i, 0))
        out_shape = jax.ShapeDtypeStruct((seq_len, d_model), x.dtype)
    else:
        # Batched 3-D path: pe broadcasts over the batch (sublane) axis inside
        # the kernel; trailing block dims equal the full array dims, so any
        # (batch, d_model) is legal.
        x_in = x
        pe_in = pe
        sub = ((batch + 7) // 8) * 8                  # sublane-padded batch
        row_x = sub * lane * itemsize
        row_pe = 8 * lane * itemsize                  # pe's batch dim (1) pads to 8
        ts, vmem_limit = _pick_seq_tile(seq_len, row_x, row_pe, lead_mult8=False)
        in_specs = [pl.BlockSpec((ts, batch, d_model), lambda i: (i, 0, 0)),
                    pl.BlockSpec((ts, 1, d_model), lambda i: (i, 0, 0))]
        out_spec = pl.BlockSpec((ts, batch, d_model), lambda i: (i, 0, 0))
        out_shape = jax.ShapeDtypeStruct((seq_len, batch, d_model), x.dtype)

    grid = (pl.cdiv(seq_len, ts),)                    # ragged last block handled by Pallas

    out = pl.pallas_call(
        _pos_enc_kernel,
        out_shape=out_shape,
        grid_spec=pltpu.PrefetchScalarGridSpec(
            num_scalar_prefetch=0,
            grid=grid,
            in_specs=in_specs,
            out_specs=out_spec,
        ),
        input_output_aliases={0: 0},                  # output aliases x (same shape/dtype)
        compiler_params=pltpu.CompilerParams(
            dimension_semantics=("parallel",),
            vmem_limit_bytes=vmem_limit,
        ),
    )(x_in, pe_in)

    return out.reshape(seq_len, batch, d_model)


if __name__ == "__main__":
    max_len = 64          # small synthetic buffer (>= seq_len)
    d_model = 32
    pe = make_pe(d_model, max_len=max_len)

    key = jax.random.PRNGKey(0)
    k1, k2 = jax.random.split(key)

    # Batched path ([seq, batch, d_model], same layout as the PyTorch module).
    seq_len, batch = 8, 2
    x = jax.random.normal(k1, (seq_len, batch, d_model), dtype=jnp.float32)
    ref = x + pe[:seq_len]                            # eval-mode dropout == identity
    out = jax.block_until_ready(positional_encoding(x, pe))
    assert out.shape == (seq_len, batch, d_model)
    assert jnp.allclose(out, ref, atol=1e-6), "batched path mismatch vs reference"

    # Batch-1 (dense 2-D) path.
    x1 = jax.random.normal(k2, (16, 1, d_model), dtype=jnp.float32)
    ref1 = x1 + pe[:16]
    out1 = jax.block_until_ready(positional_encoding(x1, pe))
    assert out1.shape == (16, 1, d_model)
    assert jnp.allclose(out1, ref1, atol=1e-6), "batch-1 path mismatch vs reference"

    print("KERNEL_OK")
</pallas_src>

<mosaic_0001>
module attributes {stable_mosaic.version = 11 : i64} {
  func.func @_pos_enc_kernel(%arg0: i32, %arg1: memref<8x2x32xf32, #tpu.memory_space<vmem>>, %arg2: memref<8x1x32xf32, #tpu.memory_space<vmem>>, %arg3: memref<8x2x32xf32, #tpu.memory_space<vmem>>) attributes {dimension_semantics = [#tpu.dimension_semantics<parallel>], iteration_bounds = array<i64: 1>, scalar_prefetch = 0 : i64, scratch_operands = 0 : i64, tpu.core_type = #tpu.core_type<tc>, window_params = [{transform_indices = @transform_0, window_bounds = array<i64: 8, 2, 32>}, {transform_indices = @transform_1, window_bounds = array<i64: 8, 1, 32>}, {transform_indices = @transform_2, window_bounds = array<i64: 8, 2, 32>}]} {
    %c0 = arith.constant 0 : index
    %c0_0 = arith.constant 0 : index
    %c0_1 = arith.constant 0 : index
    %0 = vector.load %arg1[%c0, %c0_0, %c0_1] : memref<8x2x32xf32, #tpu.memory_space<vmem>>, vector<8x2x32xf32>
    %c0_2 = arith.constant 0 : index
    %c0_3 = arith.constant 0 : index
    %c0_4 = arith.constant 0 : index
    %1 = vector.load %arg2[%c0_2, %c0_3, %c0_4] : memref<8x1x32xf32, #tpu.memory_space<vmem>>, vector<8x1x32xf32>
    %2 = vector.broadcast %1 : vector<8x1x32xf32> to vector<8x2x32xf32>
    %3 = arith.addf %0, %2 : vector<8x2x32xf32>
    %c0_5 = arith.constant 0 : index
    %c0_6 = arith.constant 0 : index
    %c0_7 = arith.constant 0 : index
    %4 = vector.load %arg3[%c0_5, %c0_6, %c0_7] : memref<8x2x32xf32, #tpu.memory_space<vmem>>, vector<8x2x32xf32>
    tpu.vector_store %arg3[%c0_5, %c0_6, %c0_7], %3 {strides = array<i32>} : memref<8x2x32xf32, #tpu.memory_space<vmem>>, vector<8x2x32xf32>,
    return
  }
  func.func @transform_0(%arg0: i32) -> (i32, i32, i32) {
    %c0_i32 = arith.constant 0 : i32
    %c0_i32_0 = arith.constant 0 : i32
    %c0_i32_1 = arith.constant 0 : i32
    return %arg0, %c0_i32, %c0_i32_0 : i32, i32, i32
  }
  func.func @transform_1(%arg0: i32) -> (i32, i32, i32) {
    %c0_i32 = arith.constant 0 : i32
    %c0_i32_0 = arith.constant 0 : i32
    %c0_i32_1 = arith.constant 0 : i32
    return %arg0, %c0_i32, %c0_i32_0 : i32, i32, i32
  }
  func.func @transform_2(%arg0: i32) -> (i32, i32, i32) {
    %c0_i32 = arith.constant 0 : i32
    %c0_i32_0 = arith.constant 0 : i32
    %c0_i32_1 = arith.constant 0 : i32
    return %arg0, %c0_i32, %c0_i32_0 : i32, i32, i32
  }
}

</mosaic_0001>

<bundles_post_ra>
// kernel: tpu_custom_call.1
= control target key start
LH: loop header
LB: loop body
LE: loop exit
PB: predicated region body
PF: predicated region fallthrough
CT: control target
= control target key end

     0   :  { %7 = vsyncpa [#allocation3], 0  ;;  %s246_s0 = inlined_call_operand.hbm [shape: f32[8,2,32], index: 0, kind: input, shape index: {}, may-alias: {0,2}]   ;;  %s247_s1 = inlined_call_operand.vmem [shape: f32[64,1,32], index: 1, kind: input, shape index: {}]   ;;  %s248_s2 = inlined_call_operand.hbm [shape: f32[8,2,32], index: 2, kind: output, shape index: {}, may-alias: {0,2}]  }
   0x1   :  { %8 = vsyncpa [#allocation4], 0  ;;  %s180_s9 = smov [#allocation2]  }
   0x2   :  { %s14_s10 = sshll.u32 %s180_s9, 4  ;;  %s15_s10 = int_to_ptr.vmem [resolvable:$true] %s14_s10 }
   0x3   :  { %s144_s11 = scalar_lea.vmem %s15_s10, 256  ;;  %p149_p1 = scmp.lt.s32.totalorder %s15_s10, %s15_s10 }
   0x4   :  { %p145_p0 = scmp.ne.s32.totalorder %s15_s10, %s144_s11  ;;  %p150_p2 = scmp.lt.s32.totalorder %s144_s11, %s144_s11 }
   0x6   :  { %p151_p3 = por %p150_p2, %p149_p1 }
   0x8   :  { %p152_p4 = pnand %p151_p3, %p145_p0 }
   0xa   :  { %155 = shalt.err (!%p152_p4)
}
   0xb   :  { %s181_s12 = smov 32   ;;  %s182_s13 = smov 2  }
   0xc   :  { %20 = dma.hbm_to_vmem [thread:$0]  %s246_s0, 256, %s15_s10, [#allocation3], %s181_s12, %s181_s12, %s182_s13  }
   0xd   :  { %176 = dma.done.wait [#allocation3], 256  }
   0xe   :  { %177 = vsyncadd [#allocation3], 4294967040  ;;  %vm98_vm0 = vcmask 254976   ;;  %s183_s16 = smov [#allocation5]   ;;  %v26_v0 = vld [vmem:[#allocation2] sm:$0x3] }
   0xf   :  { %s205_s17 = sshll.u32 %s183_s16, 4  ;;  %v124_v1 = vld [vmem:[%s247_s1] ss:$0 sm:$0xff]  ;;  %v27_v2 = vld [vmem:[#allocation2 + $0x2] sm:$0x3]  ;;  %s113_s17 = int_to_ptr.vmem [resolvable:$true] %s205_s17 }
  0x10   :  { %v90_v3 = vadd.f32 %v124_v1, %v26_v0  ;;  %v125_v4 = vld [vmem:[%s247_s1 + $0x1] ss:$0 sm:$0xff]  ;;  %v28_v5 = vld [vmem:[#allocation2 + $0x4] sm:$0x3]  ;;  %v126_v6 = vld [vmem:[%s247_s1 + $0x2] ss:$0 sm:$0xff]  ;;  %p161_p6 = scmp.lt.s32.totalorder %s113_s17, %s113_s17 }
  0x11   :  { %v91_v7 = vadd.f32 %v125_v4, %v27_v2  ;;  %v92_v8 = vadd.f32 %v126_v6, %v28_v5  ;;  %v29_v9 = vld [vmem:[#allocation2 + $0x6] sm:$0x3]  ;;  %v127_v10 = vld [vmem:[%s247_s1 + $0x3] ss:$0 sm:$0xff]  ;;  %v30_v11 = vld [vmem:[#allocation2 + $0x8] sm:$0x3] }
  0x12   :  { %99 = vst.msk [vmem:[#allocation5] sm:$0x3] %vm98_vm0, %v90_v3  ;;  %v93_v12 = vadd.f32 %v127_v10, %v29_v9  ;;  %v128_v13 = vld [vmem:[%s247_s1 + $0x4] ss:$0 sm:$0xff]  ;;  %v31_v14 = vld [vmem:[#allocation2 + $0xa] sm:$0x3] }
  0x13   :  { %v129_v15 = vld [vmem:[%s247_s1 + $0x5] ss:$0 sm:$0xff]  ;;  %100 = vst.msk [vmem:[#allocation5 + $0x2] sm:$0x3] %vm98_vm0, %v91_v7  ;;  %101 = vst.msk [vmem:[#allocation5 + $0x4] sm:$0x3] %vm98_vm0, %v92_v8  ;;  %v94_v16 = vadd.f32 %v128_v13, %v30_v11 }
  0x14   :  { %v95_v17 = vadd.f32 %v129_v15, %v31_v14  ;;  %v32_v18 = vld [vmem:[#allocation2 + $0xc] sm:$0x3]  ;;  %v130_v19 = vld [vmem:[%s247_s1 + $0x6] ss:$0 sm:$0xff]  ;;  %v33_v20 = vld [vmem:[#allocation2 + $0xe] sm:$0x3] }
  0x15   :  { %102 = vst.msk [vmem:[#allocation5 + $0x6] sm:$0x3] %vm98_vm0, %v93_v12  ;;  %v96_v21 = vadd.f32 %v130_v19, %v32_v18  ;;  %v131_v22 = vld [vmem:[%s247_s1 + $0x7] ss:$0 sm:$0xff]  ;;  %103 = vst.msk [vmem:[#allocation5 + $0x8] sm:$0x3] %vm98_vm0, %v94_v16 }
  0x16   :  { %104 = vst.msk [vmem:[#allocation5 + $0xa] sm:$0x3] %vm98_vm0, %v95_v17  ;;  %v97_v23 = vadd.f32 %v131_v22, %v33_v20  ;;  %s156_s5 = scalar_lea.vmem %s113_s17, 256 }
  0x17   :  { %105 = vst.msk [vmem:[#allocation5 + $0xc] sm:$0x3] %vm98_vm0, %v96_v21  ;;  %p157_p5 = scmp.ne.s32.totalorder %s113_s17, %s156_s5  ;;  %p162_p7 = scmp.lt.s32.totalorder %s156_s5, %s156_s5 }
  0x18   :  { %106 = vst.msk [vmem:[#allocation5 + $0xe] sm:$0x3] %vm98_vm0, %v97_v23 }
  0x19   :  { %p163_p8 = por %p162_p7, %p161_p6 }
  0x1b   :  { %p164_p9 = pnand %p163_p8, %p157_p5 }
  0x1d   :  { %167 = shalt.err (!%p164_p9)
}
  0x1e   :  { %118 = dma.vmem_to_hbm [thread:$0]  %s113_s17, 256, %s248_s2, [#allocation4], %s181_s12, %s181_s12, %s182_s13  }
  0x1f   :  { %178 = dma.done.wait [#allocation4], 256  }
  0x20   :  { %179 = vsyncadd [#allocation4], 4294967040 }
  0x21   :  { %122 = vsyncpa [#allocation3], 1 }
  0x22   :  { %123 = vsyncpa [#allocation4], 1 }

</bundles_post_ra>
